<compile_context>
chip_gen: v6e
topology: v6e:2x2x1
jax: 0.10.0
libtpu: 0.0.40
codegen_flags: <defaults>
</compile_context>

<pallas_src>
import functools

import jax
import jax.numpy as jnp
from jax import lax
from jax.experimental import pallas as pl
from jax.experimental.pallas import tpu as pltpu

EPS = 1e-5
MM_DTYPE = jnp.float32   # TODO(synk): flip to jnp.bfloat16 once ~1e-2 tolerance is acceptable.


# --------------------------------------------------------------------------- #
# fused kernel
# --------------------------------------------------------------------------- #
def _res_block_kernel(x_ref, gb_ref, fold_ref, band1_ref, band2_ref, o_ref,
                      *, img_rows, pad):
    """One program processes the whole batch in folded (N*H, W*C) layout.

    x_ref:    (N*H, WC) activations, f32
    gb_ref:   (6, WC)   packed rows [g1, b1, bias1, g2, b2, bias2], W-tiled
    fold_ref: (WC, WC)  kron(1_W, I_C) / (N*H*W): folds per-(w,c) sums into
                        per-channel means broadcast back over W
    band*_ref:(K*WC, WC) dy-stacked block-banded conv weights
    """
    x = x_ref[...]                                               # (NH, WC)
    nh, wc = x.shape
    row = lax.broadcasted_iota(jnp.int32, (nh, wc), 0) % img_rows

    def bn_relu(a, gamma, beta):
        # single-pass sum / sum-of-squares over all rows, folded over W on the MXU
        s = jnp.concatenate([jnp.sum(a, axis=0, keepdims=True),
                             jnp.sum(a * a, axis=0, keepdims=True)], axis=0)
        m = jnp.dot(s, fold_ref[...], preferred_element_type=jnp.float32)
        mean = m[0:1]
        var = m[1:2] - mean * mean
        # TODO(synk): E[x^2]-mean^2 can lose precision when |mean| >> std; switch to
        # a two-pass / Welford combine if activations are far from zero-mean.
        scale = gamma * lax.rsqrt(var + EPS)
        shift = beta - mean * scale
        return jnp.maximum(a * scale + shift, 0.0)               # BN apply + ReLU

    def shifted(a, s):
        # output row r <- input row r+s within the same image, else 0.
        if s == 0:
            return a
        if s < 0:
            rows = jnp.concatenate(
                [jnp.zeros((-s, wc), a.dtype), a[: nh + s, :]], axis=0)
            return jnp.where(row >= -s, rows, 0.0)
        rows = jnp.concatenate(
            [a[s:, :], jnp.zeros((s, wc), a.dtype)], axis=0)
        return jnp.where(row < img_rows - s, rows, 0.0)

    def conv(a, band_ref, bias):
        # lane-concat the K vertically shifted copies -> ONE depth-(K*WC) matmul
        stacked = jnp.concatenate(
            [shifted(a, dy - pad) for dy in range(2 * pad + 1)], axis=1)
        out = jnp.dot(stacked.astype(MM_DTYPE),
                      band_ref[...].astype(MM_DTYPE),
                      preferred_element_type=jnp.float32)
        return out + bias

    gb = gb_ref[...]
    h = bn_relu(x, gb[0:1], gb[1:2])
    t = conv(h, band1_ref, gb[2:3])
    h = bn_relu(t, gb[3:4], gb[4:5])
    y = conv(h, band2_ref, gb[5:6])
    o_ref[...] = y + x                                           # residual add


# --------------------------------------------------------------------------- #
# host-side setup (layout plumbing, tiny, runs once per weight set under jit)
# --------------------------------------------------------------------------- #
def _build_stacked_band(w_hwio, W, pad):
    """Fold KW taps + the C_in contraction of one conv weight into a single
    dy-stacked (KH*W*Ci, W*Co) block-banded matrix (zero blocks = W padding)."""
    KH, KW, Ci, Co = w_hwio.shape
    wi = jnp.arange(W)
    mats = []
    for dy in range(KH):
        m = jnp.zeros((W * Ci, W * Co), jnp.float32)
        for dx in range(KW):
            band = (wi[:, None] == wi[None, :] + (dx - pad)).astype(jnp.float32)
            m = m + jnp.kron(band, w_hwio[dy, dx])
        mats.append(m)
    return jnp.concatenate(mats, axis=0)                         # (KH*W*Ci, W*Co)


# --------------------------------------------------------------------------- #
# wrapper
# --------------------------------------------------------------------------- #
@functools.partial(jax.jit, static_argnums=(2, 3))
def res_block_2d(x_nchw, params, kernel_size, padding):
    """x_nchw: (N, C, H, W) float32.  Returns (N, C, H, W)."""
    w1, b1, g1, be1, w2, b2, g2, be2 = params                    # conv weights in HWIO
    N, C, H, W = x_nchw.shape
    K = kernel_size
    assert 2 * padding == K - 1, "ResBlock2d preserves spatial resolution"
    WC = W * C
    NH = N * H
    count = float(N * H * W)

    # lane-dense folded layout: (N*H, W*C)
    # TODO(synk): have callers supply/accept this folded layout (or emit NCHW via an
    # in-kernel XLU transpose) to drop the two wrapper transpose launches.
    x = jnp.transpose(x_nchw, (0, 2, 3, 1)).reshape(NH, WC).astype(jnp.float32)

    band1 = _build_stacked_band(w1, W, padding)                  # (K*WC, WC)
    band2 = _build_stacked_band(w2, W, padding)
    fold = jnp.kron(jnp.ones((W, W), jnp.float32),
                    jnp.eye(C, dtype=jnp.float32)) / count       # (WC, WC)

    def tile_row(v):
        return jnp.tile(v.reshape(-1).astype(jnp.float32), W)    # (WC,)
    gb = jnp.stack([tile_row(g1), tile_row(be1), tile_row(b1),
                    tile_row(g2), tile_row(be2), tile_row(b2)])  # (6, WC)

    # Whole problem fits comfortably in VMEM (<1 MiB), so one grid step / one launch.
    # TODO(synk): for larger N or W*C, tile N with a phase-major grid and persistent
    # VMEM scratch for t/stats, and single-buffer the grid-invariant band/fold inputs.
    y = pl.pallas_call(
        functools.partial(_res_block_kernel, img_rows=H, pad=padding),
        out_shape=jax.ShapeDtypeStruct((NH, WC), jnp.float32),
        grid=(1,),
        in_specs=[
            pl.BlockSpec((NH, WC), lambda i: (0, 0)),            # x
            pl.BlockSpec((6, WC), lambda i: (0, 0)),             # packed affine rows
            pl.BlockSpec((WC, WC), lambda i: (0, 0)),            # fold matrix
            pl.BlockSpec((K * WC, WC), lambda i: (0, 0)),        # band1
            pl.BlockSpec((K * WC, WC), lambda i: (0, 0)),        # band2
        ],
        out_specs=pl.BlockSpec((NH, WC), lambda i: (0, 0)),
        compiler_params=pltpu.CompilerParams(
            dimension_semantics=("arbitrary",)),                 # N=2: stay on one TC
    )(x, gb, fold, band1, band2)

    return jnp.transpose(y.reshape(N, H, W, C), (0, 3, 1, 2))    # back to NCHW


# --------------------------------------------------------------------------- #
# pure-JAX reference (module semantics) for validation
# --------------------------------------------------------------------------- #
def reference(x_nchw, params, padding):
    w1, b1, g1, be1, w2, b2, g2, be2 = params
    x = jnp.transpose(x_nchw, (0, 2, 3, 1))

    def bn_relu(t, gamma, beta):
        mean = jnp.mean(t, axis=(0, 1, 2), keepdims=True)
        var = jnp.var(t, axis=(0, 1, 2), keepdims=True)
        y = (t - mean) / jnp.sqrt(var + EPS)
        y = y * gamma.reshape(1, 1, 1, -1) + beta.reshape(1, 1, 1, -1)
        return jnp.maximum(y, 0.0)

    def conv(t, w, b):
        y = lax.conv_general_dilated(
            t, w, window_strides=(1, 1),
            padding=[(padding, padding), (padding, padding)],
            dimension_numbers=('NHWC', 'HWIO', 'NHWC'))
        return y + b.reshape(1, 1, 1, -1)

    h = conv(bn_relu(x, g1, be1), w1, b1)
    h = conv(bn_relu(h, g2, be2), w2, b2)
    return jnp.transpose(h + x, (0, 3, 1, 2))


if __name__ == "__main__":
    N, C, H, W = 2, 8, 16, 16          # in_features=8  -> W*C = 128 (lane-dense)
    K, P = 3, 1                        # kernel_size=3, padding=1

    key = jax.random.PRNGKey(0)
    ks = jax.random.split(key, 9)
    x = jax.random.normal(ks[0], (N, C, H, W), jnp.float32)
    w1 = 0.1 * jax.random.normal(ks[1], (K, K, C, C), jnp.float32)   # HWIO
    b1 = 0.1 * jax.random.normal(ks[2], (1, C), jnp.float32)
    g1 = 1.0 + 0.1 * jax.random.normal(ks[3], (1, C), jnp.float32)
    be1 = 0.1 * jax.random.normal(ks[4], (1, C), jnp.float32)
    w2 = 0.1 * jax.random.normal(ks[5], (K, K, C, C), jnp.float32)
    b2 = 0.1 * jax.random.normal(ks[6], (1, C), jnp.float32)
    g2 = 1.0 + 0.1 * jax.random.normal(ks[7], (1, C), jnp.float32)
    be2 = 0.1 * jax.random.normal(ks[8], (1, C), jnp.float32)
    params = (w1, b1, g1, be1, w2, b2, g2, be2)

    out = jax.block_until_ready(res_block_2d(x, params, K, P))
    ref = reference(x, params, P)

    err = float(jnp.max(jnp.abs(out - ref)))
    assert out.shape == (N, C, H, W) and out.dtype == jnp.float32
    assert jnp.allclose(out, ref, atol=1e-4, rtol=1e-4), f"max abs err = {err}"
    print("KERNEL_OK")
</pallas_src>

<mosaic_0001>
module attributes {stable_mosaic.version = 11 : i64} {
  func.func @_res_block_kernel(%arg0: i32, %arg1: memref<32x128xf32, #tpu.memory_space<vmem>>, %arg2: memref<6x128xf32, #tpu.memory_space<vmem>>, %arg3: memref<128x128xf32, #tpu.memory_space<vmem>>, %arg4: memref<384x128xf32, #tpu.memory_space<vmem>>, %arg5: memref<384x128xf32, #tpu.memory_space<vmem>>, %arg6: memref<32x128xf32, #tpu.memory_space<vmem>>) attributes {dimension_semantics = [#tpu.dimension_semantics<arbitrary>], iteration_bounds = array<i64: 1>, scalar_prefetch = 0 : i64, scratch_operands = 0 : i64, tpu.core_type = #tpu.core_type<tc>, window_params = [{pipeline_mode = #tpu.pipeline_mode<synchronous>, transform_indices = @transform_0, window_bounds = array<i64: 32, 128>}, {pipeline_mode = #tpu.pipeline_mode<synchronous>, transform_indices = @transform_1, window_bounds = array<i64: 6, 128>}, {pipeline_mode = #tpu.pipeline_mode<synchronous>, transform_indices = @transform_2, window_bounds = array<i64: 128, 128>}, {pipeline_mode = #tpu.pipeline_mode<synchronous>, transform_indices = @transform_3, window_bounds = array<i64: 384, 128>}, {pipeline_mode = #tpu.pipeline_mode<synchronous>, transform_indices = @transform_4, window_bounds = array<i64: 384, 128>}, {pipeline_mode = #tpu.pipeline_mode<synchronous>, transform_indices = @transform_5, window_bounds = array<i64: 32, 128>}]} {
    %c0 = arith.constant 0 : index
    %c0_0 = arith.constant 0 : index
    %0 = vector.load %arg1[%c0, %c0_0] : memref<32x128xf32, #tpu.memory_space<vmem>>, vector<32x128xf32>
    %1 = tpu.iota {dimensions = array<i32: 0>} : vector<32x128xi32>
    %c16_i32 = arith.constant 16 : i32
    %c0_i32 = arith.constant 0 : i32
    %2 = arith.cmpi eq, %c16_i32, %c0_i32 : i32
    %c1_i32 = arith.constant 1 : i32
    %3 = arith.select %2, %c1_i32, %c16_i32 : i32
    %4 = vector.broadcast %3 : i32 to vector<32x128xi32>
    %5 = arith.remsi %1, %4 : vector<32x128xi32>
    %c0_i32_1 = arith.constant 0 : i32
    %6 = vector.broadcast %c0_i32_1 : i32 to vector<32x128xi32>
    %7 = arith.cmpi ne, %5, %6 : vector<32x128xi32>
    %c0_i32_2 = arith.constant 0 : i32
    %8 = vector.broadcast %c0_i32_2 : i32 to vector<32x128xi32>
    %9 = arith.cmpi slt, %5, %8 : vector<32x128xi32>
    %c0_i32_3 = arith.constant 0 : i32
    %10 = arith.cmpi slt, %3, %c0_i32_3 : i32
    %11 = vector.broadcast %10 : i1 to vector<32x128xi1>
    %12 = vector.broadcast %11 : vector<32x128xi1> to vector<32x128xi1>
    %13 = arith.xori %9, %12 : vector<32x128xi1>
    %14 = arith.andi %13, %7 : vector<32x128xi1>
    %15 = vector.broadcast %3 : i32 to vector<32x128xi32>
    %16 = arith.addi %5, %15 : vector<32x128xi32>
    %17 = arith.select %14, %16, %5 : vector<32x128xi1>, vector<32x128xi32>
    %c0_4 = arith.constant 0 : index
    %c0_5 = arith.constant 0 : index
    %18 = vector.load %arg2[%c0_4, %c0_5] : memref<6x128xf32, #tpu.memory_space<vmem>>, vector<6x128xf32>
    %19 = vector.extract_strided_slice %18 {offsets = [0, 0], sizes = [1, 128], strides = [1, 1]} : vector<6x128xf32> to vector<1x128xf32>
    %20 = vector.extract_strided_slice %18 {offsets = [1, 0], sizes = [1, 128], strides = [1, 1]} : vector<6x128xf32> to vector<1x128xf32>
    %cst = arith.constant dense<0.000000e+00> : vector<128xf32>
    %21 = vector.multi_reduction <add>, %0, %cst [0] : vector<32x128xf32> to vector<128xf32>
    %22 = vector.shape_cast %21 : vector<128xf32> to vector<1x128xf32>
    %23 = arith.mulf %0, %0 : vector<32x128xf32>
    %cst_6 = arith.constant dense<0.000000e+00> : vector<128xf32>
    %24 = vector.multi_reduction <add>, %23, %cst_6 [0] : vector<32x128xf32> to vector<128xf32>
    %25 = vector.shape_cast %24 : vector<128xf32> to vector<1x128xf32>
    %26 = tpu.concatenate %22, %25 in 0 : vector<1x128xf32>, vector<1x128xf32> -> vector<2x128xf32>
    %c0_7 = arith.constant 0 : index
    %c0_8 = arith.constant 0 : index
    %27 = vector.load %arg3[%c0_7, %c0_8] : memref<128x128xf32, #tpu.memory_space<vmem>>, vector<128x128xf32>
    %cst_9 = arith.constant dense<0.000000e+00> : vector<2x128xf32>
    %28 = tpu.matmul %26, %27, %cst_9 {dimension_numbers = #tpu.dot_dimension_numbers<[1], [0], [0], [1], [0, 0, 1, 1], [], []>} : vector<2x128xf32>, vector<128x128xf32>, vector<2x128xf32> -> vector<2x128xf32>
    %29 = vector.extract_strided_slice %28 {offsets = [0, 0], sizes = [1, 128], strides = [1, 1]} : vector<2x128xf32> to vector<1x128xf32>
    %30 = vector.extract_strided_slice %28 {offsets = [1, 0], sizes = [1, 128], strides = [1, 1]} : vector<2x128xf32> to vector<1x128xf32>
    %31 = arith.mulf %29, %29 : vector<1x128xf32>
    %32 = arith.subf %30, %31 : vector<1x128xf32>
    %cst_10 = arith.constant 9.99999974E-6 : f32
    %33 = vector.broadcast %cst_10 : f32 to vector<1x128xf32>
    %34 = arith.addf %32, %33 : vector<1x128xf32>
    %35 = math.rsqrt %34 : vector<1x128xf32>
    %36 = arith.mulf %19, %35 : vector<1x128xf32>
    %37 = arith.mulf %29, %36 : vector<1x128xf32>
    %38 = arith.subf %20, %37 : vector<1x128xf32>
    %39 = vector.broadcast %36 : vector<1x128xf32> to vector<32x128xf32>
    %40 = arith.mulf %0, %39 : vector<32x128xf32>
    %41 = vector.broadcast %38 : vector<1x128xf32> to vector<32x128xf32>
    %42 = arith.addf %40, %41 : vector<32x128xf32>
    %cst_11 = arith.constant 0.000000e+00 : f32
    %43 = vector.broadcast %cst_11 : f32 to vector<32x128xf32>
    %44 = arith.maximumf %42, %43 : vector<32x128xf32>
    %45 = vector.extract_strided_slice %18 {offsets = [2, 0], sizes = [1, 128], strides = [1, 1]} : vector<6x128xf32> to vector<1x128xf32>
    %cst_12 = arith.constant 0.000000e+00 : f32
    %46 = vector.broadcast %cst_12 : f32 to vector<1x128xf32>
    %47 = vector.extract_strided_slice %44 {offsets = [0, 0], sizes = [31, 128], strides = [1, 1]} : vector<32x128xf32> to vector<31x128xf32>
    %48 = tpu.concatenate %46, %47 in 0 : vector<1x128xf32>, vector<31x128xf32> -> vector<32x128xf32>
    %c1_i32_13 = arith.constant 1 : i32
    %49 = vector.broadcast %c1_i32_13 : i32 to vector<32x128xi32>
    %50 = arith.cmpi sge, %17, %49 : vector<32x128xi32>
    %cst_14 = arith.constant 0.000000e+00 : f32
    %51 = vector.broadcast %cst_14 : f32 to vector<32x128xf32>
    %52 = arith.select %50, %48, %51 : vector<32x128xi1>, vector<32x128xf32>
    %53 = vector.extract_strided_slice %44 {offsets = [1, 0], sizes = [31, 128], strides = [1, 1]} : vector<32x128xf32> to vector<31x128xf32>
    %cst_15 = arith.constant 0.000000e+00 : f32
    %54 = vector.broadcast %cst_15 : f32 to vector<1x128xf32>
    %55 = tpu.concatenate %53, %54 in 0 : vector<31x128xf32>, vector<1x128xf32> -> vector<32x128xf32>
    %c15_i32 = arith.constant 15 : i32
    %56 = vector.broadcast %c15_i32 : i32 to vector<32x128xi32>
    %57 = arith.cmpi slt, %17, %56 : vector<32x128xi32>
    %cst_16 = arith.constant 0.000000e+00 : f32
    %58 = vector.broadcast %cst_16 : f32 to vector<32x128xf32>
    %59 = arith.select %57, %55, %58 : vector<32x128xi1>, vector<32x128xf32>
    %60 = tpu.concatenate %52, %44, %59 in 1 : vector<32x128xf32>, vector<32x128xf32>, vector<32x128xf32> -> vector<32x384xf32>
    %c0_17 = arith.constant 0 : index
    %c0_18 = arith.constant 0 : index
    %61 = vector.load %arg4[%c0_17, %c0_18] : memref<384x128xf32, #tpu.memory_space<vmem>>, vector<384x128xf32>
    %cst_19 = arith.constant dense<0.000000e+00> : vector<32x128xf32>
    %62 = tpu.matmul %60, %61, %cst_19 {dimension_numbers = #tpu.dot_dimension_numbers<[1], [0], [0], [1], [0, 0, 1, 1], [], []>} : vector<32x384xf32>, vector<384x128xf32>, vector<32x128xf32> -> vector<32x128xf32>
    %63 = vector.broadcast %45 : vector<1x128xf32> to vector<32x128xf32>
    %64 = arith.addf %62, %63 : vector<32x128xf32>
    %65 = vector.extract_strided_slice %18 {offsets = [3, 0], sizes = [1, 128], strides = [1, 1]} : vector<6x128xf32> to vector<1x128xf32>
    %66 = vector.extract_strided_slice %18 {offsets = [4, 0], sizes = [1, 128], strides = [1, 1]} : vector<6x128xf32> to vector<1x128xf32>
    %cst_20 = arith.constant dense<0.000000e+00> : vector<128xf32>
    %67 = vector.multi_reduction <add>, %64, %cst_20 [0] : vector<32x128xf32> to vector<128xf32>
    %68 = vector.shape_cast %67 : vector<128xf32> to vector<1x128xf32>
    %69 = arith.mulf %64, %64 : vector<32x128xf32>
    %cst_21 = arith.constant dense<0.000000e+00> : vector<128xf32>
    %70 = vector.multi_reduction <add>, %69, %cst_21 [0] : vector<32x128xf32> to vector<128xf32>
    %71 = vector.shape_cast %70 : vector<128xf32> to vector<1x128xf32>
    %72 = tpu.concatenate %68, %71 in 0 : vector<1x128xf32>, vector<1x128xf32> -> vector<2x128xf32>
    %c0_22 = arith.constant 0 : index
    %c0_23 = arith.constant 0 : index
    %73 = vector.load %arg3[%c0_22, %c0_23] : memref<128x128xf32, #tpu.memory_space<vmem>>, vector<128x128xf32>
    %cst_24 = arith.constant dense<0.000000e+00> : vector<2x128xf32>
    %74 = tpu.matmul %72, %73, %cst_24 {dimension_numbers = #tpu.dot_dimension_numbers<[1], [0], [0], [1], [0, 0, 1, 1], [], []>} : vector<2x128xf32>, vector<128x128xf32>, vector<2x128xf32> -> vector<2x128xf32>
    %75 = vector.extract_strided_slice %74 {offsets = [0, 0], sizes = [1, 128], strides = [1, 1]} : vector<2x128xf32> to vector<1x128xf32>
    %76 = vector.extract_strided_slice %74 {offsets = [1, 0], sizes = [1, 128], strides = [1, 1]} : vector<2x128xf32> to vector<1x128xf32>
    %77 = arith.mulf %75, %75 : vector<1x128xf32>
    %78 = arith.subf %76, %77 : vector<1x128xf32>
    %cst_25 = arith.constant 9.99999974E-6 : f32
    %79 = vector.broadcast %cst_25 : f32 to vector<1x128xf32>
    %80 = arith.addf %78, %79 : vector<1x128xf32>
    %81 = math.rsqrt %80 : vector<1x128xf32>
    %82 = arith.mulf %65, %81 : vector<1x128xf32>
    %83 = arith.mulf %75, %82 : vector<1x128xf32>
    %84 = arith.subf %66, %83 : vector<1x128xf32>
    %85 = vector.broadcast %82 : vector<1x128xf32> to vector<32x128xf32>
    %86 = arith.mulf %64, %85 : vector<32x128xf32>
    %87 = vector.broadcast %84 : vector<1x128xf32> to vector<32x128xf32>
    %88 = arith.addf %86, %87 : vector<32x128xf32>
    %cst_26 = arith.constant 0.000000e+00 : f32
    %89 = vector.broadcast %cst_26 : f32 to vector<32x128xf32>
    %90 = arith.maximumf %88, %89 : vector<32x128xf32>
    %91 = vector.extract_strided_slice %18 {offsets = [5, 0], sizes = [1, 128], strides = [1, 1]} : vector<6x128xf32> to vector<1x128xf32>
    %cst_27 = arith.constant 0.000000e+00 : f32
    %92 = vector.broadcast %cst_27 : f32 to vector<1x128xf32>
    %93 = vector.extract_strided_slice %90 {offsets = [0, 0], sizes = [31, 128], strides = [1, 1]} : vector<32x128xf32> to vector<31x128xf32>
    %94 = tpu.concatenate %92, %93 in 0 : vector<1x128xf32>, vector<31x128xf32> -> vector<32x128xf32>
    %c1_i32_28 = arith.constant 1 : i32
    %95 = vector.broadcast %c1_i32_28 : i32 to vector<32x128xi32>
    %96 = arith.cmpi sge, %17, %95 : vector<32x128xi32>
    %cst_29 = arith.constant 0.000000e+00 : f32
    %97 = vector.broadcast %cst_29 : f32 to vector<32x128xf32>
    %98 = arith.select %96, %94, %97 : vector<32x128xi1>, vector<32x128xf32>
    %99 = vector.extract_strided_slice %90 {offsets = [1, 0], sizes = [31, 128], strides = [1, 1]} : vector<32x128xf32> to vector<31x128xf32>
    %cst_30 = arith.constant 0.000000e+00 : f32
    %100 = vector.broadcast %cst_30 : f32 to vector<1x128xf32>
    %101 = tpu.concatenate %99, %100 in 0 : vector<31x128xf32>, vector<1x128xf32> -> vector<32x128xf32>
    %c15_i32_31 = arith.constant 15 : i32
    %102 = vector.broadcast %c15_i32_31 : i32 to vector<32x128xi32>
    %103 = arith.cmpi slt, %17, %102 : vector<32x128xi32>
    %cst_32 = arith.constant 0.000000e+00 : f32
    %104 = vector.broadcast %cst_32 : f32 to vector<32x128xf32>
    %105 = arith.select %103, %101, %104 : vector<32x128xi1>, vector<32x128xf32>
    %106 = tpu.concatenate %98, %90, %105 in 1 : vector<32x128xf32>, vector<32x128xf32>, vector<32x128xf32> -> vector<32x384xf32>
    %c0_33 = arith.constant 0 : index
    %c0_34 = arith.constant 0 : index
    %107 = vector.load %arg5[%c0_33, %c0_34] : memref<384x128xf32, #tpu.memory_space<vmem>>, vector<384x128xf32>
    %cst_35 = arith.constant dense<0.000000e+00> : vector<32x128xf32>
    %108 = tpu.matmul %106, %107, %cst_35 {dimension_numbers = #tpu.dot_dimension_numbers<[1], [0], [0], [1], [0, 0, 1, 1], [], []>} : vector<32x384xf32>, vector<384x128xf32>, vector<32x128xf32> -> vector<32x128xf32>
    %109 = vector.broadcast %91 : vector<1x128xf32> to vector<32x128xf32>
    %110 = arith.addf %108, %109 : vector<32x128xf32>
    %111 = arith.addf %110, %0 : vector<32x128xf32>
    %c0_36 = arith.constant 0 : index
    %c0_37 = arith.constant 0 : index
    %112 = vector.load %arg6[%c0_36, %c0_37] : memref<32x128xf32, #tpu.memory_space<vmem>>, vector<32x128xf32>
    tpu.vector_store %arg6[%c0_36, %c0_37], %111 {strides = array<i32>} : memref<32x128xf32, #tpu.memory_space<vmem>>, vector<32x128xf32>,
    return
  }
  func.func @transform_0(%arg0: i32) -> (i32, i32) {
    %c0_i32 = arith.constant 0 : i32
    %c0_i32_0 = arith.constant 0 : i32
    %c0_i32_1 = arith.constant 0 : i32
    return %c0_i32, %c0_i32_0 : i32, i32
  }
  func.func @transform_1(%arg0: i32) -> (i32, i32) {
    %c0_i32 = arith.constant 0 : i32
    %c0_i32_0 = arith.constant 0 : i32
    %c0_i32_1 = arith.constant 0 : i32
    return %c0_i32, %c0_i32_0 : i32, i32
  }
  func.func @transform_2(%arg0: i32) -> (i32, i32) {
    %c0_i32 = arith.constant 0 : i32
    %c0_i32_0 = arith.constant 0 : i32
    %c0_i32_1 = arith.constant 0 : i32
    return %c0_i32, %c0_i32_0 : i32, i32
  }
  func.func @transform_3(%arg0: i32) -> (i32, i32) {
    %c0_i32 = arith.constant 0 : i32
    %c0_i32_0 = arith.constant 0 : i32
    %c0_i32_1 = arith.constant 0 : i32
    return %c0_i32, %c0_i32_0 : i32, i32
  }
  func.func @transform_4(%arg0: i32) -> (i32, i32) {
    %c0_i32 = arith.constant 0 : i32
    %c0_i32_0 = arith.constant 0 : i32
    %c0_i32_1 = arith.constant 0 : i32
    return %c0_i32, %c0_i32_0 : i32, i32
  }
  func.func @transform_5(%arg0: i32) -> (i32, i32) {
    %c0_i32 = arith.constant 0 : i32
    %c0_i32_0 = arith.constant 0 : i32
    %c0_i32_1 = arith.constant 0 : i32
    return %c0_i32, %c0_i32_0 : i32, i32
  }
}

</mosaic_0001>

<bundles_post_ra>
// kernel: tile.26
= control target key start
LH: loop header
LB: loop body
LE: loop exit
PB: predicated region body
PF: predicated region fallthrough
CT: control target
= control target key end

     0   :  { %s28_s0 = inlined_call_operand.vmem [shape: f32[8], index: 0, kind: input, shape index: {}]   ;;  %s29_s1 = inlined_call_operand.vmem [shape: f32[16,8], index: 1, kind: output, shape index: {}]  }
   0x1   :  { %v4_v0 = vld [vmem:[%s28_s0] ss:$0 sm:$0xff] }
   0x2   :  { %5 = vst [vmem:[%s29_s1] sm:$0xff] %v4_v0  ;;  %8 = vst [vmem:[%s29_s1 + $0x8] sm:$0xff] %v4_v0 }

// kernel: tile.42
= control target key start
LH: loop header
LB: loop body
LE: loop exit
PB: predicated region body
PF: predicated region fallthrough
CT: control target
= control target key end

     0   :  { %s133_s10 = smov 120   ;;  %s134_s11 = smov 104   ;;  %vm3_vm0 = vcmask 64512   ;;  %vm9_vm1 = vcmask 1048512   ;;  %vm15_vm2 = vcmask 982912   ;;  %vm21_vm3 = vcmask 917312   ;;  %s209_s0 = inlined_call_operand.vmem [shape: f32[16,8], index: 0, kind: input, shape index: {}]   ;;  %s210_s1 = inlined_call_operand.vmem [shape: f32[1,128], index: 1, kind: output, shape index: {}]  }
   0x1   :  { %v103_v0 = vld [vmem:[%s209_s0 + $0xf] sm:$0x1]   ;;  %v105_v1 = vld [vmem:[%s209_s0 + $0xd] sm:$0x1]   ;;  %v104_v2 = vld [vmem:[%s209_s0 + $0xe] sm:$0x1]  }
   0x2   :  { %7 = vrot.lane.b32.xlu0 %v103_v0, %s133_s10  ;;  %19 = vrot.lane.b32.xlu1 %v105_v1, %s134_s11  ;;  %v106_v3 = vld [vmem:[%s209_s0 + $0xc] sm:$0x1]   ;;  %s135_s16 = smov 112   ;;  %s136_s17 = smov 96   ;;  %v107_v4 = vld [vmem:[%s209_s0 + $0xb] sm:$0x1]  }
   0x3   :  { %v108_v5 = vld [vmem:[%s209_s0 + $0xa] sm:$0x1]   ;;  %v2_v6 = vld [vmem:[%s209_s0] sm:$0x1]   ;;  %s137_s24 = smov 88   ;;  %s138_s25 = smov 80  }
   0x4   :  { %4 = vst.msk [vmem:[#allocation0] sm:$0x1] %vm3_vm0, %v2_v6   ;;  %v109_v7 = vld [vmem:[%s209_s0 + $0x9] sm:$0x1]   ;;  %v110_v8 = vld [vmem:[%s209_s0 + $0x8] sm:$0x1]  }
   0x5   :  { %s139_s30 = smov 72   ;;  %s140_s2 = smov 64   ;;  %v111_v9 = vld [vmem:[%s209_s0 + $0x7] sm:$0x1]   ;;  %v112_v10 = vld [vmem:[%s209_s0 + $0x6] sm:$0x1]  }
   0x6   :  { %13 = vrot.lane.b32.xlu0 %v104_v2, %s135_s16  ;;  %25 = vrot.lane.b32.xlu1 %v106_v3, %s136_s17  ;;  %s141_s7 = smov 56   ;;  %s142_s8 = smov 48   ;;  %v113_v11 = vld [vmem:[%s209_s0 + $0x5] sm:$0x1]   ;;  %v114_v12 = vld [vmem:[%s209_s0 + $0x4] sm:$0x1]  }
   0x7   :  { %s143_s13 = smov 40   ;;  %s144_s14 = smov 32   ;;  %v115_v13 = vld [vmem:[%s209_s0 + $0x3] sm:$0x1]   ;;  %v116_v14 = vld [vmem:[%s209_s0 + $0x2] sm:$0x1]  }
   0x8   :  { %s145_s19 = smov 24   ;;  %s146_s20 = smov 16   ;;  %v117_v15 = vld [vmem:[%s209_s0 + $0x1] sm:$0x1]   ;;  %vm27_vm4 = vcmask 851712   ;;  %vm33_vm5 = vcmask 786112  }
   0x9   :  { %s147_s0 = smov 8   ;;  %vm39_vm6 = vcmask 720512   ;;  %vm45_vm7 = vcmask 654912   ;;  %vm51_vm8 = vcmask 589312   ;;  %vm57_vm9 = vcmask 523712  }
   0xa   :  { %31 = vrot.lane.b32.xlu0 %v107_v4, %s137_s24  ;;  %37 = vrot.lane.b32.xlu1 %v108_v5, %s138_s25  ;;  %vm63_vm10 = vcmask 458112   ;;  %vm69_vm11 = vcmask 392512   ;;  %vm75_vm12 = vcmask 326912   ;;  %vm81_vm13 = vcmask 261312  }
   0xb   :  { %vm87_vm14 = vcmask 195712   ;;  %vm93_vm15 = vcmask 130112  }
   0xe   :  { %43 = vrot.lane.b32.xlu0 %v109_v7, %s139_s30  ;;  %49 = vrot.lane.b32.xlu1 %v110_v8, %s140_s2 }
  0x12   :  { %55 = vrot.lane.b32.xlu0 %v111_v9, %s141_s7  ;;  %61 = vrot.lane.b32.xlu1 %v112_v10, %s142_s8 }
  0x16   :  { %67 = vrot.lane.b32.xlu0 %v113_v11, %s143_s13  ;;  %73 = vrot.lane.b32.xlu1 %v114_v12, %s144_s14 }
  0x1a   :  { %79 = vrot.lane.b32.xlu0 %v115_v13, %s145_s19  ;;  %85 = vrot.lane.b32.xlu1 %v116_v14, %s146_s20 }
  0x1e   :  { %91 = vrot.lane.b32.xlu0 %v117_v15, %s147_s0 }
  0x74   :  { %v8_v16 = vpop.permute.xlu0 %7   ;;  %v20_v17 = vpop.permute.xlu1 %19  }
  0x75   :  { %10 = vst.msk [vmem:[#allocation0] sm:$0x1] %vm9_vm1, %v8_v16  }
  0x78   :  { %v14_v18 = vpop.permute.xlu0 %13   ;;  %v26_v19 = vpop.permute.xlu1 %25  }
  0x79   :  { %16 = vst.msk [vmem:[#allocation0] sm:$0x1] %vm15_vm2, %v14_v18  }
  0x7a   :  { %22 = vst.msk [vmem:[#allocation0] sm:$0x1] %vm21_vm3, %v20_v17  }
  0x7b   :  { %28 = vst.msk [vmem:[#allocation0] sm:$0x1] %vm27_vm4, %v26_v19  }
  0x7c   :  { %v32_v20 = vpop.permute.xlu0 %31   ;;  %v38_v21 = vpop.permute.xlu1 %37  }
  0x7d   :  { %34 = vst.msk [vmem:[#allocation0] sm:$0x1] %vm33_vm5, %v32_v20  }
  0x7e   :  { %40 = vst.msk [vmem:[#allocation0] sm:$0x1] %vm39_vm6, %v38_v21  }
  0x80   :  { %v44_v22 = vpop.permute.xlu0 %43   ;;  %v50_v23 = vpop.permute.xlu1 %49  }
  0x81   :  { %46 = vst.msk [vmem:[#allocation0] sm:$0x1] %vm45_vm7, %v44_v22  }
  0x82   :  { %52 = vst.msk [vmem:[#allocation0] sm:$0x1] %vm51_vm8, %v50_v23  }
  0x84   :  { %v56_v24 = vpop.permute.xlu0 %55   ;;  %v62_v25 = vpop.permute.xlu1 %61  }
  0x85   :  { %58 = vst.msk [vmem:[#allocation0] sm:$0x1] %vm57_vm9, %v56_v24  }
  0x86   :  { %64 = vst.msk [vmem:[#allocation0] sm:$0x1] %vm63_vm10, %v62_v25  }
  0x88   :  { %v68_v26 = vpop.permute.xlu0 %67   ;;  %v74_v27 = vpop.permute.xlu1 %73  }
  0x89   :  { %70 = vst.msk [vmem:[#allocation0] sm:$0x1] %vm69_vm11, %v68_v26  }
  0x8a   :  { %76 = vst.msk [vmem:[#allocation0] sm:$0x1] %vm75_vm12, %v74_v27  }
  0x8c   :  { %v80_v28 = vpop.permute.xlu0 %79   ;;  %v86_v29 = vpop.permute.xlu1 %85  }
  0x8d   :  { %82 = vst.msk [vmem:[#allocation0] sm:$0x1] %vm81_vm13, %v80_v28  }
  0x8e   :  { %88 = vst.msk [vmem:[#allocation0] sm:$0x1] %vm87_vm14, %v86_v29  }
  0x90   :  { %v92_v30 = vpop.permute.xlu0 %91  }
  0x91   :  { %94 = vst.msk [vmem:[#allocation0] sm:$0x1] %vm93_vm15, %v92_v30  }
  0x98   :  { %v99_v31 = vld [vmem:[#allocation0] sm:$0x1] }
  0x99   :  { %102 = vst [vmem:[%s210_s1] sm:$0x1] %v99_v31 }

// kernel: res_block_2d.1
= control target key start
LH: loop header
LB: loop body
LE: loop exit
PB: predicated region body
PF: predicated region fallthrough
CT: control target
= control target key end

     0   :  { %v1219_v0 = vmov 0.0   ;;  %vm1220_vm0 = vmmov 0   ;;  %vm100_vm1 = vcmask 1040384   ;;  %vm248_vm3 = vcmask 1046528   ;;  %s1844_s2 = inlined_call_operand.vmem [shape: f32[128,128], index: 2, kind: input, shape index: {}]   ;;  %s1845_s0 = inlined_call_operand.vmem [shape: f32[32,128], index: 0, kind: input, shape index: {}]   ;;  %s1846_s3 = inlined_call_operand.vmem [shape: f32[384,128], index: 3, kind: input, shape index: {}]   ;;  %s1847_s1 = inlined_call_operand.vmem [shape: f32[6,128], index: 1, kind: input, shape index: {}]   ;;  %s1848_s4 = inlined_call_operand.vmem [shape: f32[384,128], index: 4, kind: input, shape index: {}]   ;;  %s1849_s5 = inlined_call_operand.vmem [shape: f32[32,128], index: 5, kind: output, shape index: {}]  }
   0x1   :  { %1063 = vmatprep.subr.mxu0 %v1219_v0  ;;  %v1255_v1 = vld [vmem:[%s1844_s2 + $0x78] sm:$0xff]  ;;  %v1260_v2 = vld [vmem:[%s1844_s2 + $0x70] sm:$0xff]  ;;  %1095 = vmatprep.mubr.msk.f32.mxu0 %vm1220_vm0, %v1219_v0  ;;  %v1269_v3 = vld [vmem:[%s1844_s2 + $0x68] sm:$0xff] }
   0x2   :  { %1064 = vmatpush3.msra.mxu0 %v1255_v1  ;;  %v1276_v4 = vld [vmem:[%s1844_s2 + $0x60] sm:$0xff]  ;;  %v1287_v6 = vld [vmem:[%s1845_s0 + $0x8] sm:$0xff]  ;;  %v1293_v7 = vld [vmem:[%s1844_s2 + $0x58] sm:$0xff] }
   0x3   :  { %1065 = vmatprep.subr.mxu0 %v1219_v0  ;;  %v1282_v5 = vld [vmem:[%s1845_s0] sm:$0xff]  ;;  %v1298_v8 = vld [vmem:[%s1845_s0 + $0x10] sm:$0xff]  ;;  %v1303_v9 = vld [vmem:[%s1845_s0 + $0x18] sm:$0xff]  ;;  %v88_v12 = vmul.f32 %v1287_v6, %v1287_v6 }
   0x4   :  { %1066 = vmatpush3.msra.mxu0 %v1260_v2  ;;  %v78_v10 = vadd.f32 %v1287_v6, %v1282_v5  ;;  %v87_v11 = vmul.f32 %v1282_v5, %v1282_v5  ;;  %v89_v13 = vmul.f32 %v1298_v8, %v1298_v8  ;;  %v1318_v14 = vld [vmem:[%s1844_s2 + $0x50] sm:$0xff]  ;;  %v90_v16 = vmul.f32 %v1303_v9, %v1303_v9  ;;  %v1328_v18 = vld [vmem:[%s1844_s2 + $0x48] sm:$0xff]  ;;  %v1336_v21 = vld [vmem:[%s1844_s2 + $0x40] sm:$0xff] }
   0x5   :  { %1067 = vmatprep.subr.mxu0 %v1219_v0  ;;  %v1343_v24 = vld [vmem:[%s1844_s2 + $0x38] sm:$0xff]  ;;  %v1350_v27 = vld [vmem:[%s1844_s2 + $0x30] sm:$0xff]  ;;  %v1357_v30 = vld [vmem:[%s1844_s2 + $0x28] sm:$0xff] }
   0x6   :  { %1068 = vmatpush3.msra.mxu0 %v1269_v3  ;;  %v79_v15 = vadd.f32 %v78_v10, %v1298_v8  ;;  %v91_v17 = vadd.f32 %v88_v12, %v87_v11  ;;  %v1364_v33 = vld [vmem:[%s1844_s2 + $0x20] sm:$0xff]  ;;  %v1371_v36 = vld [vmem:[%s1844_s2 + $0x18] sm:$0xff]  ;;  %v1378_v38 = vld [vmem:[%s1844_s2 + $0x10] sm:$0xff] }
   0x7   :  { %1069 = vmatprep.subr.mxu0 %v1219_v0  ;;  %v1385_v41 = vld [vmem:[%s1844_s2 + $0x8] sm:$0xff]  ;;  %v1392_v42 = vld [vmem:[%s1844_s2] sm:$0xff]  ;;  %v300_v44 = vld [vmem:[%s1846_s3 + $0xf8] sm:$0xff] }
   0x8   :  { %1070 = vmatpush3.msra.mxu0 %v1276_v4  ;;  %v80_v19 = vadd.f32 %v79_v15, %v1303_v9  ;;  %v92_v20 = vadd.f32 %v91_v17, %v89_v13  ;;  %918 = vmatprep.subr.mxu1 %v300_v44  ;;  %v284_v45 = vld [vmem:[%s1846_s3 + $0x78] sm:$0xff]  ;;  %v299_v47 = vld [vmem:[%s1846_s3 + $0xf0] sm:$0xff]  ;;  %v298_v50 = vld [vmem:[%s1846_s3 + $0xe8] sm:$0xff] }
   0x9   :  { %1071 = vmatprep.subr.mxu0 %v1219_v0  ;;  %v316_v46 = vld [vmem:[%s1846_s3 + $0x178] sm:$0xff]  ;;  %919 = vmatpush3.msra.mxu1 %v284_v45  ;;  %v283_v48 = vld [vmem:[%s1846_s3 + $0x70] sm:$0xff]  ;;  %v282_v51 = vld [vmem:[%s1846_s3 + $0x68] sm:$0xff] }
   0xa   :  { %1072 = vmatpush3.msra.mxu0 %v1293_v7  ;;  %v81_v22 = vrot.slane %v80_v19, 4  ;;  %v93_v23 = vadd.f32 %v92_v20, %v90_v16  ;;  %920 = vmatprep.subr.mxu1 %v299_v47  ;;  %v315_v49 = vld [vmem:[%s1846_s3 + $0x170] sm:$0xff]  ;;  %v314_v52 = vld [vmem:[%s1846_s3 + $0x168] sm:$0xff]  ;;  %v297_v53 = vld [vmem:[%s1846_s3 + $0xe0] sm:$0xff] }
   0xb   :  { %1073 = vmatprep.subr.mxu0 %v1219_v0  ;;  %921 = vmatpush3.msra.mxu1 %v283_v48  ;;  %v281_v54 = vld [vmem:[%s1846_s3 + $0x60] sm:$0xff]  ;;  %v296_v56 = vld [vmem:[%s1846_s3 + $0xd8] sm:$0xff]  ;;  %v295_v59 = vld [vmem:[%s1846_s3 + $0xd0] sm:$0xff] }
   0xc   :  { %1074 = vmatpush3.msra.mxu0 %v1318_v14  ;;  %v82_v25 = vadd.f32 %v81_v22, %v80_v19  ;;  %v94_v26 = vrot.slane %v93_v23, 4  ;;  %922 = vmatprep.subr.mxu1 %v298_v50  ;;  %v313_v55 = vld [vmem:[%s1846_s3 + $0x160] sm:$0xff]  ;;  %v280_v57 = vld [vmem:[%s1846_s3 + $0x58] sm:$0xff]  ;;  %v279_v60 = vld [vmem:[%s1846_s3 + $0x50] sm:$0xff] }
   0xd   :  { %1075 = vmatprep.subr.mxu0 %v1219_v0  ;;  %923 = vmatpush3.msra.mxu1 %v282_v51  ;;  %v312_v58 = vld [vmem:[%s1846_s3 + $0x158] sm:$0xff]  ;;  %v311_v61 = vld [vmem:[%s1846_s3 + $0x150] sm:$0xff]  ;;  %v294_v62 = vld [vmem:[%s1846_s3 + $0xc8] sm:$0xff] }
   0xe   :  { %1076 = vmatpush3.msra.mxu0 %v1328_v18  ;;  %v83_v28 = vrot.slane %v82_v25, 2  ;;  %v95_v29 = vadd.f32 %v94_v26, %v93_v23  ;;  %924 = vmatprep.subr.mxu1 %v297_v53  ;;  %v278_v63 = vld [vmem:[%s1846_s3 + $0x48] sm:$0xff]  ;;  %v293_v11 = vld [vmem:[%s1846_s3 + $0xc0] sm:$0xff]  ;;  %v292_v15 = vld [vmem:[%s1846_s3 + $0xb8] sm:$0xff] }
   0xf   :  { %1077 = vmatprep.subr.mxu0 %v1219_v0  ;;  %925 = vmatpush3.msra.mxu1 %v281_v54  ;;  %v310_v10 = vld [vmem:[%s1846_s3 + $0x148] sm:$0xff]  ;;  %v277_v12 = vld [vmem:[%s1846_s3 + $0x40] sm:$0xff]  ;;  %v276_v16 = vld [vmem:[%s1846_s3 + $0x38] sm:$0xff] }
  0x10   :  { %1078 = vmatpush3.msra.mxu0 %v1336_v21  ;;  %v84_v31 = vadd.f32 %v83_v28, %v82_v25  ;;  %v96_v32 = vrot.slane %v95_v29, 2  ;;  %926 = vmatprep.subr.mxu1 %v296_v56  ;;  %v309_v13 = vld [vmem:[%s1846_s3 + $0x140] sm:$0xff]  ;;  %v308_v17 = vld [vmem:[%s1846_s3 + $0x138] sm:$0xff]  ;;  %v291_v19 = vld [vmem:[%s1846_s3 + $0xb0] sm:$0xff] }
  0x11   :  { %1079 = vmatprep.subr.mxu0 %v1219_v0  ;;  %927 = vmatpush3.msra.mxu1 %v280_v57  ;;  %v275_v20 = vld [vmem:[%s1846_s3 + $0x30] sm:$0xff]  ;;  %v290_v23 = vld [vmem:[%s1846_s3 + $0xa8] sm:$0xff]  ;;  %v289_v28 = vld [vmem:[%s1846_s3 + $0xa0] sm:$0xff] }
  0x12   :  { %1080 = vmatpush3.msra.mxu0 %v1343_v24  ;;  %v97_v34 = vadd.f32 %v96_v32, %v95_v29  ;;  %v85_v35 = vrot.slane %v84_v31, 1  ;;  %928 = vmatprep.subr.mxu1 %v295_v59  ;;  %v307_v22 = vld [vmem:[%s1846_s3 + $0x130] sm:$0xff]  ;;  %v274_v25 = vld [vmem:[%s1846_s3 + $0x28] sm:$0xff]  ;;  %v273_v29 = vld [vmem:[%s1846_s3 + $0x20] sm:$0xff] }
  0x13   :  { %1081 = vmatprep.subr.mxu0 %v1219_v0  ;;  %929 = vmatpush3.msra.mxu1 %v279_v60  ;;  %v306_v26 = vld [vmem:[%s1846_s3 + $0x128] sm:$0xff]  ;;  %v288_v32 = vld [vmem:[%s1846_s3 + $0x98] sm:$0xff]  ;;  %v269_v47 = vld [vmem:[%s1846_s3] sm:$0xff] }
  0x14   :  { %1082 = vmatpush3.msra.mxu0 %v1350_v27  ;;  %v98_v37 = vrot.slane %v97_v34, 1  ;;  %v86_v39 = vadd.f32 %v85_v35, %v84_v31  ;;  %930 = vmatprep.subr.mxu1 %v294_v62  ;;  %v305_v31 = vld [vmem:[%s1846_s3 + $0x120] sm:$0xff]  ;;  %v304_v35 = vld [vmem:[%s1846_s3 + $0x118] sm:$0xff]  ;;  %v270_v44 = vld [vmem:[%s1846_s3 + $0x8] sm:$0xff] }
  0x15   :  { %1083 = vmatprep.subr.mxu0 %v1219_v0  ;;  %931 = vmatpush3.msra.mxu1 %v278_v63  ;;  %v302_v45 = vld [vmem:[%s1846_s3 + $0x108] sm:$0xff]  ;;  %v301_v48 = vld [vmem:[%s1846_s3 + $0x100] sm:$0xff] }
  0x16   :  { %1084 = vmatpush3.msra.mxu0 %v1357_v30  ;;  %v99_v40 = vadd.f32 %v98_v37, %v97_v34  ;;  %932 = vmatprep.subr.mxu1 %v293_v11  ;;  %v272_v34 = vld [vmem:[%s1846_s3 + $0x18] sm:$0xff]  ;;  %v287_v37 = vld [vmem:[%s1846_s3 + $0x90] sm:$0xff] }
  0x17   :  { %1085 = vmatprep.subr.mxu0 %v1219_v0  ;;  %933 = vmatpush3.msra.mxu1 %v277_v12 }
  0x18   :  { %1086 = vmatpush3.msra.mxu0 %v1364_v33  ;;  %v101_v43 = vsel %vm100_vm1, %v86_v39, %v99_v40  ;;  %934 = vmatprep.subr.mxu1 %v292_v15  ;;  %v271_v39 = vld [vmem:[%s1846_s3 + $0x10] sm:$0xff] }
  0x19   :  { %1087 = vmatprep.subr.mxu0 %v1219_v0  ;;  %935 = vmatpush3.msra.mxu1 %v276_v16  ;;  %v303_v40 = vld [vmem:[%s1846_s3 + $0x110] sm:$0xff] }
  0x1a   :  { %1088 = vmatpush3.msra.mxu0 %v1371_v36  ;;  %936 = vmatprep.subr.mxu1 %v291_v19 }
  0x1b   :  { %1089 = vmatprep.subr.mxu0 %v1219_v0  ;;  %937 = vmatpush3.msra.mxu1 %v275_v20 }
  0x1c   :  { %1090 = vmatpush3.msra.mxu0 %v1378_v38  ;;  %938 = vmatprep.subr.mxu1 %v290_v23 }
  0x1d   :  { %1091 = vmatprep.subr.mxu0 %v1219_v0  ;;  %939 = vmatpush3.msra.mxu1 %v274_v25 }
  0x1e   :  { %1092 = vmatpush3.msra.mxu0 %v1385_v41  ;;  %940 = vmatprep.subr.mxu1 %v289_v28 }
  0x1f   :  { %1093 = vmatprep.subr.mxu0 %v1219_v0  ;;  %941 = vmatpush3.msra.mxu1 %v273_v29 }
  0x20   :  { %1094 = vmatpush3.msra.mxu0 %v1392_v42  ;;  %942 = vmatprep.subr.mxu1 %v288_v32 }
  0x21   :  { %1096 = vmatmul.mubr.f32.vlgmr.msra.gmra.mxu0 %v101_v43  ;;  %1098 = vmatprep.subr.mxu0 %v316_v46  ;;  %v286_v43 = vld [vmem:[%s1846_s3 + $0x88] sm:$0xff] }
  0x22   :  { %1099 = vmatpush3.msra.mxu0 %v316_v46  ;;  %943 = vmatpush3.msra.mxu1 %v272_v34  ;;  %v285_v46 = vld [vmem:[%s1846_s3 + $0x80] sm:$0xff] }
  0x23   :  { %1100 = vmatprep.subr.mxu0 %v315_v49  ;;  %944 = vmatprep.subr.mxu1 %v287_v37 }
  0x24   :  { %1101 = vmatpush3.msra.mxu0 %v315_v49  ;;  %945 = vmatpush3.msra.mxu1 %v271_v39 }
  0x25   :  { %1102 = vmatprep.subr.mxu0 %v314_v52  ;;  %946 = vmatprep.subr.mxu1 %v286_v43 }
  0x26   :  { %1103 = vmatpush3.msra.mxu0 %v314_v52  ;;  %947 = vmatpush3.msra.mxu1 %v270_v44 }
  0x27   :  { %1104 = vmatprep.subr.mxu0 %v313_v55  ;;  %948 = vmatprep.subr.mxu1 %v285_v46 }
  0x28   :  { %1105 = vmatpush3.msra.mxu0 %v313_v55  ;;  %949 = vmatpush3.msra.mxu1 %v269_v47  ;;  %v24_v55 = vlaneseq }
  0x29   :  { %1106 = vmatprep.subr.mxu0 %v312_v58  ;;  %1136 = vmatprep.subr.mxu1 %v1219_v0 }
  0x2a   :  { %1107 = vmatpush3.msra.mxu0 %v312_v58  ;;  %v1543_v56 = vshrl.u32 %v24_v55, 7  ;;  %v1548_v58 = vld [vmem:[%s1847_s1] sm:$0x3f] }
  0x2b   :  { %1108 = vmatprep.subr.mxu0 %v311_v61 }
  0x2c   :  { %1109 = vmatpush3.msra.mxu0 %v311_v61  ;;  %v206_v60 = vsub.s32 0, %v1543_v56  ;;  %v214_v11 = vsub.s32 1, %v1543_v56  ;;  %v26_v15 = vadd.s32 8, %v1543_v56 }
  0x2d   :  { %1110 = vmatprep.subr.mxu0 %v310_v10 }
  0x2e   :  { %1111 = vmatpush3.msra.mxu0 %v310_v10  ;;  %v40_v29 = vand.u32 15, %v26_v15 }
  0x2f   :  { %1112 = vmatprep.subr.mxu0 %v309_v13 }
  0x30   :  { %1113 = vmatpush3.msra.mxu0 %v309_v13  ;;  %vm1566_vm4 = vcmp.lt.s32.totalorder %v40_v29, 15 }
  0x31   :  { %1114 = vmatprep.subr.mxu0 %v308_v17 }
  0x32   :  { %1115 = vmatpush3.msra.mxu0 %v308_v17 }
  0x33   :  { %1116 = vmatprep.subr.mxu0 %v307_v22 }
  0x34   :  { %1117 = vmatpush3.msra.mxu0 %v307_v22  ;;  %v33_v22 = vand.u32 15, %v1543_v56 }
  0x35   :  { %1118 = vmatprep.subr.mxu0 %v306_v26 }
  0x36   :  { %1119 = vmatpush3.msra.mxu0 %v306_v26  ;;  %vm1561_vm2 = vcmp.ge.s32.totalorder %v33_v22, 1 }
  0x37   :  { %1120 = vmatprep.subr.mxu0 %v305_v31 }
  0x38   :  { %1121 = vmatpush3.msra.mxu0 %v305_v31  ;;  %v28_v31 = vadd.s32 24, %v1543_v56 }
  0x39   :  { %1122 = vmatprep.subr.mxu0 %v304_v35 }
  0x3a   :  { %1123 = vmatpush3.msra.mxu0 %v304_v35 }
  0x3b   :  { %1124 = vmatprep.subr.mxu0 %v303_v40 }
  0x3c   :  { %1125 = vmatpush3.msra.mxu0 %v303_v40 }
  0x3d   :  { %1126 = vmatprep.subr.mxu0 %v302_v45 }
  0x3e   :  { %1127 = vmatpush3.msra.mxu0 %v302_v45  ;;  %v54_v45 = vand.u32 15, %v28_v31 }
  0x3f   :  { %1128 = vmatprep.subr.mxu0 %v301_v48 }
  0x40   :  { %1129 = vmatpush3.msra.mxu0 %v301_v48  ;;  %vm1578_vm5 = vcmp.lt.s32.totalorder %v54_v45, 15 }
  0xe1   :  { %v184_v49 = vpop.f32.mrf.mxu0 }
  0xe2   :  { %v188_v50 = vmul.f32 %v184_v49, %v184_v49 }
  0xe3   :  { %v1097_v51 = vpop.f32.mrf.mxu0 }
  0xe4   :  { %v190_v52 = vrot.slane %v188_v50, 7 }
  0xe6   :  { %v192_v53 = vsub.f32 %v184_v49, %v190_v52 }
  0xe8   :  { %v193_v54 = vadd.f32 1e-05, %v192_v53 }
  0xea   :  { %1211 = vrsqrt.f32 %v193_v54 }
  0xf7   :  { %v1212_v57 = vpop.eup %1211 }
  0xf8   :  { %v196_v59 = vrot.slane %v1212_v57, 1 }
  0xfa   :  { %v198_v61 = vmul.f32 %v196_v59, %v1548_v58 }
  0xfc   :  { %v199_v62 = vmul.f32 %v198_v61, %v184_v49  ;;  %v207_v63 = vrot.slane %v198_v61, %v206_v60 }
  0xfe   :  { %v201_v10 = vrot.slane %v199_v62, 7  ;;  %v210_v13 = vmul.f32 %v207_v63, %v1298_v8  ;;  %v208_v17 = vmul.f32 %v207_v63, %v1282_v5  ;;  %v209_v19 = vmul.f32 %v207_v63, %v1287_v6 }
  0xff   :  { %v211_v20 = vmul.f32 %v207_v63, %v1303_v9  ;;  %v27_v5 = vadd.s32 16, %v1543_v56 }
 0x100   :  { %v203_v12 = vsub.f32 %v1548_v58, %v201_v10 }
 0x101   :  { %v47_v51 = vand.u32 15, %v27_v5 }
 0x102   :  { %v215_v16 = vrot.slane %v203_v12, %v214_v11 }
 0x103   :  { %vm1588_vm6 = vcmp.ge.s32.totalorder %v47_v51, 1  ;;  %v706_v51 = vld [vmem:[%s1848_s4 + $0x178] sm:$0xff] }
 0x104   :  { %v216_v23 = vadd.f32 %v215_v16, %v208_v17  ;;  %v217_v25 = vadd.f32 %v215_v16, %v209_v19  ;;  %v218_v26 = vadd.f32 %v215_v16, %v210_v13  ;;  %v219_v28 = vadd.f32 %v215_v16, %v211_v20 }
 0x106   :  { %v220_v32 = vmax.f32 %v216_v23, 0.0  ;;  %v221_v8 = vmax.f32 %v217_v25, 0.0  ;;  %v222_v34 = vmax.f32 %v218_v26, 0.0  ;;  %v223_v35 = vmax.f32 %v219_v28, 0.0 }
 0x108   :  { %385 = vmatprep.mubr.f32.mxu1 %v220_v32  ;;  %v228_v6 = vrot.slane %v220_v32, 7  ;;  %v249_v9 = vrot.slane %v220_v32, 1  ;;  %v250_v39 = vrot.slane %v221_v8, 1  ;;  %v252_v40 = vrot.slane %v222_v34, 1 }
 0x109   :  { %v254_v44 = vrot.slane %v223_v35, 1  ;;  %v229_v49 = vrot.slane %v221_v8, 7  ;;  %v231_v54 = vrot.slane %v222_v34, 7  ;;  %v233_v59 = vrot.slane %v223_v35, 7 }
 0x10a   :  { %v239_v46 = vsel %vm100_vm1, 0.0, %v228_v6  ;;  %v251_v47 = vsel %vm248_vm3, %v249_v9, %v250_v39  ;;  %v253_v48 = vsel %vm248_vm3, %v250_v39, %v252_v40 }
 0x10b   :  { %893 = vmatmul.mubr.msk.f32.vlgmr.msra.gmra.mxu1 %vm1561_vm2, %v239_v46  ;;  %1130 = vmatprep.mubr.f32.mxu0 %v251_v47  ;;  %v255_v50 = vsel %vm248_vm3, %v252_v40, %v254_v44  ;;  %v230_v53 = vsel %vm100_vm1, %v228_v6, %v229_v49  ;;  %v260_v55 = vsel %vm248_vm3, %v254_v44, 0.0  ;;  %v234_v60 = vsel %vm100_vm1, %v231_v54, %v233_v59  ;;  %v672_v59 = vld [vmem:[%s1848_s4 + $0x68] sm:$0xff] }
 0x10c   :  { %390 = vmatprep.mubr.f32.mxu1 %v221_v8  ;;  %1131 = vmatmul.mubr.msk.f32.vlgmr.msra.gmra.mxu0 %vm1566_vm4, %v253_v48 }
 0x10d   :  { %1133 = vmatprep.mubr.f32.mxu0 %v255_v50  ;;  %1137 = vmatpush3.msra.mxu1 %v1255_v1  ;;  %v232_v1 = vsel %vm100_vm1, %v229_v49, %v231_v54  ;;  %v690_v49 = vld [vmem:[%s1848_s4 + $0xf8] sm:$0xff]  ;;  %v673_v54 = vld [vmem:[%s1848_s4 + $0x70] sm:$0xff] }
 0x10e   :  { %1138 = vmatprep.subr.mxu1 %v1219_v0  ;;  %999 = vmatprep.subr.mxu0 %v690_v49  ;;  %v674_v50 = vld [vmem:[%s1848_s4 + $0x78] sm:$0xff] }
 0x10f   :  { %391 = vmatmul.mubr.f32.gmra.mxu1 %v230_v53  ;;  %1000 = vmatpush3.msra.mxu0 %v674_v50  ;;  %v689_v53 = vld [vmem:[%s1848_s4 + $0xf0] sm:$0xff] }
 0x110   :  { %395 = vmatprep.mubr.f32.mxu1 %v222_v34  ;;  %1134 = vmatmul.mubr.msk.f32.gmra.mxu0 %vm1578_vm5, %v260_v55  ;;  %v705_v55 = vld [vmem:[%s1848_s4 + $0x170] sm:$0xff] }
 0x111   :  { %1139 = vmatpush3.msra.mxu1 %v1260_v2  ;;  %1001 = vmatprep.subr.mxu0 %v689_v53  ;;  %v605_v53 = vsub.s32 3, %v1543_v56 }
 0x112   :  { %1140 = vmatprep.subr.mxu1 %v1219_v0  ;;  %1002 = vmatpush3.msra.mxu0 %v673_v54 }
 0x113   :  { %894 = vmatmul.mubr.msk.f32.gmra.mxu1 %vm1588_vm6, %v232_v1  ;;  %v688_v1 = vld [vmem:[%s1848_s4 + $0xe8] sm:$0xff] }
 0x114   :  { %400 = vmatprep.mubr.f32.mxu1 %v223_v35  ;;  %1141 = vmatpush3.msra.mxu1 %v1269_v3  ;;  %v319_v3 = vsub.s32 2, %v1543_v56 }
 0x115   :  { %1142 = vmatprep.subr.mxu1 %v1219_v0  ;;  %1003 = vmatprep.subr.mxu0 %v688_v1 }
 0x116   :  { %1143 = vmatpush3.msra.mxu1 %v1276_v4  ;;  %1004 = vmatpush3.msra.mxu0 %v672_v59 }
 0x117   :  { %401 = vmatmul.mubr.f32.gmra.mxu1 %v234_v60  ;;  %1144 = vmatprep.subr.mxu1 %v1219_v0  ;;  %v704_v60 = vld [vmem:[%s1848_s4 + $0x168] sm:$0xff] }
 0x118   :  { %1145 = vmatpush3.msra.mxu1 %v1293_v7  ;;  %1168 = vmatprep.mubr.msk.f32.mxu1 %vm1220_vm0, %v1219_v0 }
 0x119   :  { %1146 = vmatprep.subr.mxu1 %v1219_v0 }
 0x11a   :  { %1147 = vmatpush3.msra.mxu1 %v1318_v14 }
 0x11b   :  { %1148 = vmatprep.subr.mxu1 %v1219_v0 }
 0x11c   :  { %1149 = vmatpush3.msra.mxu1 %v1328_v18 }
 0x11d   :  { %1150 = vmatprep.subr.mxu1 %v1219_v0 }
 0x11e   :  { %1151 = vmatpush3.msra.mxu1 %v1336_v21  ;;  %v320_v21 = vrot.slane %v1548_v58, %v319_v3  ;;  %v671_v3 = vld [vmem:[%s1848_s4 + $0x60] sm:$0xff] }
 0x11f   :  { %1152 = vmatprep.subr.mxu1 %v1219_v0 }
 0x120   :  { %1153 = vmatpush3.msra.mxu1 %v1343_v24 }
 0x121   :  { %1154 = vmatprep.subr.mxu1 %v1219_v0 }
 0x122   :  { %1155 = vmatpush3.msra.mxu1 %v1350_v27 }
 0x123   :  { %1156 = vmatprep.subr.mxu1 %v1219_v0 }
 0x124   :  { %1157 = vmatpush3.msra.mxu1 %v1357_v30 }
 0x125   :  { %1158 = vmatprep.subr.mxu1 %v1219_v0 }
 0x126   :  { %1159 = vmatpush3.msra.mxu1 %v1364_v33 }
 0x127   :  { %1160 = vmatprep.subr.mxu1 %v1219_v0 }
 0x128   :  { %1161 = vmatpush3.msra.mxu1 %v1371_v36 }
 0x129   :  { %1162 = vmatprep.subr.mxu1 %v1219_v0 }
 0x12a   :  { %1163 = vmatpush3.msra.mxu1 %v1378_v38 }
 0x12b   :  { %1164 = vmatprep.subr.mxu1 %v1219_v0 }
 0x12c   :  { %1165 = vmatpush3.msra.mxu1 %v1385_v41 }
 0x12d   :  { %1166 = vmatprep.subr.mxu1 %v1219_v0 }
 0x12e   :  { %1167 = vmatpush3.msra.mxu1 %v1392_v42 }
 0x12f   :  { %1171 = vmatprep.subr.mxu1 %v706_v51 }
 0x1cb   :  { %v950_v2 = vpop.f32.mrf.mxu1 }
 0x1cc   :  { %v1132_v4 = vpop.f32.mrf.mxu0 }
 0x1cd   :  { %v951_v7 = vpop.f32.mrf.mxu1 }
 0x1ce   :  { %v952_v18 = vadd.f32 %v951_v7, %v950_v2  ;;  %v472_v24 = vpop.f32.mrf.mxu0  ;;  %v687_v2 = vld [vmem:[%s1848_s4 + $0xe0] sm:$0xff]  ;;  %v686_v7 = vld [vmem:[%s1848_s4 + $0xd8] sm:$0xff] }
 0x1cf   :  { %v953_v14 = vpop.f32.mrf.mxu1  ;;  %1005 = vmatprep.subr.mxu0 %v687_v2 }
 0x1d0   :  { %v388_v36 = vadd.f32 %v952_v18, %v320_v21  ;;  %v1135_v41 = vpop.f32.mrf.mxu0  ;;  %1006 = vmatpush3.msra.mxu0 %v671_v3  ;;  %v702_v18 = vld [vmem:[%s1848_s4 + $0x158] sm:$0xff] }
 0x1d1   :  { %v954_v27 = vpop.f32.mrf.mxu1  ;;  %1007 = vmatprep.subr.mxu0 %v686_v7 }
 0x1d2   :  { %v955_v30 = vadd.f32 %v954_v27, %v953_v14  ;;  %v1631_v63 = vadd.f32 %v472_v24, %v388_v36  ;;  %v482_v11 = vpop.f32.mrf.mxu0  ;;  %v670_v14 = vld [vmem:[%s1848_s4 + $0x58] sm:$0xff]  ;;  %v669_v24 = vld [vmem:[%s1848_s4 + $0x50] sm:$0xff]  ;;  %v700_v36 = vld [vmem:[%s1848_s4 + $0x148] sm:$0xff] }
 0x1d3   :  { %v956_v33 = vpop.f32.mrf.mxu1  ;;  %1008 = vmatpush3.msra.mxu0 %v670_v14  ;;  %v701_v27 = vld [vmem:[%s1848_s4 + $0x150] sm:$0xff] }
 0x1d4   :  { %v393_v38 = vadd.f32 %v955_v30, %v320_v21  ;;  %v500_v17 = vmul.f32 %v1631_v63, %v1631_v63  ;;  %v684_v30 = vld [vmem:[%s1848_s4 + $0xc8] sm:$0xff] }
 0x1d5   :  { %v957_v61 = vpop.f32.mrf.mxu1 }
 0x1d6   :  { %v1629_v0 = vadd.f32 %v1132_v4, %v393_v38  ;;  %v958_v42 = vadd.f32 %v957_v61, %v956_v33  ;;  %v703_v4 = vld [vmem:[%s1848_s4 + $0x160] sm:$0xff]  ;;  %v668_v33 = vld [vmem:[%s1848_s4 + $0x48] sm:$0xff] }
 0x1d7   :  { %v959_v62 = vpop.f32.mrf.mxu1  ;;  %v683_v38 = vld [vmem:[%s1848_s4 + $0xc0] sm:$0xff] }
 0x1d8   :  { %v398_v10 = vadd.f32 %v958_v42, %v320_v21  ;;  %v501_v13 = vmul.f32 %v1629_v0, %v1629_v0  ;;  %v491_v19 = vadd.f32 %v1629_v0, %v1631_v63  ;;  %v699_v61 = vld [vmem:[%s1848_s4 + $0x140] sm:$0xff]  ;;  %v682_v42 = vld [vmem:[%s1848_s4 + $0xb8] sm:$0xff] }
 0x1d9   :  { %v960_v12 = vpop.f32.mrf.mxu1 }
 0x1da   :  { %v1635_v15 = vadd.f32 %v482_v11, %v398_v10  ;;  %v961_v16 = vadd.f32 %v960_v12, %v959_v62  ;;  %v504_v23 = vadd.f32 %v501_v13, %v500_v17  ;;  %v666_v62 = vld [vmem:[%s1848_s4 + $0x38] sm:$0xff]  ;;  %v681_v11 = vld [vmem:[%s1848_s4 + $0xb0] sm:$0xff]  ;;  %v664_v17 = vld [vmem:[%s1848_s4 + $0x28] sm:$0xff] }
 0x1db   :  { %v698_v10 = vld [vmem:[%s1848_s4 + $0x138] sm:$0xff]  ;;  %v665_v12 = vld [vmem:[%s1848_s4 + $0x30] sm:$0xff] }
 0x1dc   :  { %v502_v20 = vmul.f32 %v1635_v15, %v1635_v15  ;;  %v403_v22 = vadd.f32 %v961_v16, %v320_v21  ;;  %v492_v25 = vadd.f32 %v491_v19, %v1635_v15  ;;  %v685_v21 = vld [vmem:[%s1848_s4 + $0xd0] sm:$0xff]  ;;  %v680_v16 = vld [vmem:[%s1848_s4 + $0xa8] sm:$0xff] }
 0x1dd   :  { %1009 = vmatprep.subr.mxu0 %v685_v21  ;;  %v697_v13 = vld [vmem:[%s1848_s4 + $0x130] sm:$0xff]  ;;  %v696_v19 = vld [vmem:[%s1848_s4 + $0x128] sm:$0xff] }
 0x1de   :  { %v1644_v26 = vadd.f32 %v1135_v41, %v403_v22  ;;  %v505_v28 = vadd.f32 %v504_v23, %v502_v20  ;;  %1010 = vmatpush3.msra.mxu0 %v669_v24  ;;  %v667_v41 = vld [vmem:[%s1848_s4 + $0x40] sm:$0xff] }
 0x1df   :  { %1011 = vmatprep.subr.mxu0 %v684_v30  ;;  %v679_v20 = vld [vmem:[%s1848_s4 + $0xa0] sm:$0xff] }
 0x1e0   :  { %v493_v29 = vadd.f32 %v492_v25, %v1644_v26  ;;  %v503_v31 = vmul.f32 %v1644_v26, %v1644_v26  ;;  %1012 = vmatpush3.msra.mxu0 %v668_v33  ;;  %v663_v22 = vld [vmem:[%s1848_s4 + $0x20] sm:$0xff]  ;;  %v678_v25 = vld [vmem:[%s1848_s4 + $0x98] sm:$0xff] }
 0x1e1   :  { %1013 = vmatprep.subr.mxu0 %v683_v38  ;;  %v695_v23 = vld [vmem:[%s1848_s4 + $0x120] sm:$0xff] }
 0x1e2   :  { %v494_v32 = vrot.slane %v493_v29, 4  ;;  %v506_v8 = vadd.f32 %v505_v28, %v503_v31  ;;  %1014 = vmatpush3.msra.mxu0 %v667_v41  ;;  %v662_v28 = vld [vmem:[%s1848_s4 + $0x18] sm:$0xff]  ;;  %v677_v31 = vld [vmem:[%s1848_s4 + $0x90] sm:$0xff] }
 0x1e3   :  { %1015 = vmatprep.subr.mxu0 %v682_v42 }
 0x1e4   :  { %v495_v34 = vadd.f32 %v494_v32, %v493_v29  ;;  %v507_v35 = vrot.slane %v506_v8, 4  ;;  %1016 = vmatpush3.msra.mxu0 %v666_v62  ;;  %v694_v29 = vld [vmem:[%s1848_s4 + $0x118] sm:$0xff]  ;;  %v661_v32 = vld [vmem:[%s1848_s4 + $0x10] sm:$0xff] }
 0x1e5   :  { %1017 = vmatprep.subr.mxu0 %v681_v11 }
 0x1e6   :  { %v496_v5 = vrot.slane %v495_v34, 2  ;;  %v508_v6 = vadd.f32 %v507_v35, %v506_v8  ;;  %1018 = vmatpush3.msra.mxu0 %v665_v12  ;;  %v693_v8 = vld [vmem:[%s1848_s4 + $0x110] sm:$0xff]  ;;  %v660_v35 = vld [vmem:[%s1848_s4 + $0x8] sm:$0xff] }
 0x1e7   :  { %1019 = vmatprep.subr.mxu0 %v680_v16 }
 0x1e8   :  { %v497_v9 = vadd.f32 %v496_v5, %v495_v34  ;;  %v509_v39 = vrot.slane %v508_v6, 2  ;;  %1020 = vmatpush3.msra.mxu0 %v664_v17  ;;  %v676_v34 = vld [vmem:[%s1848_s4 + $0x88] sm:$0xff] }
 0x1e9   :  { %1021 = vmatprep.subr.mxu0 %v679_v20  ;;  %v692_v5 = vld [vmem:[%s1848_s4 + $0x108] sm:$0xff]  ;;  %v709_v20 = vsub.s32 5, %v1543_v56 }
 0x1ea   :  { %v498_v40 = vrot.slane %v497_v9, 1  ;;  %v510_v44 = vadd.f32 %v509_v39, %v508_v6  ;;  %1022 = vmatpush3.msra.mxu0 %v663_v22  ;;  %v675_v6 = vld [vmem:[%s1848_s4 + $0x80] sm:$0xff] }
 0x1eb   :  { %1023 = vmatprep.subr.mxu0 %v678_v25  ;;  %v691_v39 = vld [vmem:[%s1848_s4 + $0x100] sm:$0xff] }
 0x1ec   :  { %v511_v45 = vrot.slane %v510_v44, 1  ;;  %v499_v46 = vadd.f32 %v498_v40, %v497_v9  ;;  %1024 = vmatpush3.msra.mxu0 %v662_v28  ;;  %v659_v9 = vld [vmem:[%s1848_s4] sm:$0xff] }
 0x1ed   :  { %1025 = vmatprep.subr.mxu0 %v677_v31 }
 0x1ee   :  { %v512_v47 = vadd.f32 %v511_v45, %v510_v44  ;;  %1026 = vmatpush3.msra.mxu0 %v661_v32 }
 0x1ef   :  { %1027 = vmatprep.subr.mxu0 %v676_v34 }
 0x1f0   :  { %v513_v48 = vsel %vm100_vm1, %v499_v46, %v512_v47  ;;  %1028 = vmatpush3.msra.mxu0 %v660_v35 }
 0x1f1   :  { %1169 = vmatmul.mubr.f32.vlgmr.msra.gmra.mxu1 %v513_v48  ;;  %1029 = vmatprep.subr.mxu0 %v675_v6 }
 0x1f2   :  { %1172 = vmatpush3.msra.mxu1 %v706_v51  ;;  %1030 = vmatpush3.msra.mxu0 %v659_v9 }
 0x1f3   :  { %1173 = vmatprep.subr.mxu1 %v705_v55 }
 0x1f4   :  { %1174 = vmatpush3.msra.mxu1 %v705_v55 }
 0x1f5   :  { %1175 = vmatprep.subr.mxu1 %v704_v60 }
 0x1f6   :  { %1176 = vmatpush3.msra.mxu1 %v704_v60  ;;  %v613_v60 = vsub.s32 4, %v1543_v56 }
 0x1f7   :  { %1177 = vmatprep.subr.mxu1 %v703_v4 }
 0x1f8   :  { %1178 = vmatpush3.msra.mxu1 %v703_v4 }
 0x1f9   :  { %1179 = vmatprep.subr.mxu1 %v702_v18 }
 0x1fa   :  { %1180 = vmatpush3.msra.mxu1 %v702_v18 }
 0x1fb   :  { %1181 = vmatprep.subr.mxu1 %v701_v27 }
 0x1fc   :  { %1182 = vmatpush3.msra.mxu1 %v701_v27 }
 0x1fd   :  { %1183 = vmatprep.subr.mxu1 %v700_v36 }
 0x1fe   :  { %1184 = vmatpush3.msra.mxu1 %v700_v36 }
 0x1ff   :  { %1185 = vmatprep.subr.mxu1 %v699_v61 }
 0x200   :  { %1186 = vmatpush3.msra.mxu1 %v699_v61 }
 0x201   :  { %1187 = vmatprep.subr.mxu1 %v698_v10 }
 0x202   :  { %1188 = vmatpush3.msra.mxu1 %v698_v10 }
 0x203   :  { %1189 = vmatprep.subr.mxu1 %v697_v13 }
 0x204   :  { %1190 = vmatpush3.msra.mxu1 %v697_v13 }
 0x205   :  { %1191 = vmatprep.subr.mxu1 %v696_v19 }
 0x206   :  { %1192 = vmatpush3.msra.mxu1 %v696_v19 }
 0x207   :  { %1193 = vmatprep.subr.mxu1 %v695_v23 }
 0x208   :  { %1194 = vmatpush3.msra.mxu1 %v695_v23  ;;  %v710_v23 = vrot.slane %v1548_v58, %v709_v20 }
 0x209   :  { %1195 = vmatprep.subr.mxu1 %v694_v29 }
 0x20a   :  { %1196 = vmatpush3.msra.mxu1 %v694_v29 }
 0x20b   :  { %1197 = vmatprep.subr.mxu1 %v693_v8 }
 0x20c   :  { %1198 = vmatpush3.msra.mxu1 %v693_v8 }
 0x20d   :  { %1199 = vmatprep.subr.mxu1 %v692_v5 }
 0x20e   :  { %1200 = vmatpush3.msra.mxu1 %v692_v5  ;;  %v1215_v5 = vld [vmem:[%s1845_s0] sm:$0xff] }
 0x20f   :  { %1201 = vmatprep.subr.mxu1 %v691_v39 }
 0x210   :  { %1202 = vmatpush3.msra.mxu1 %v691_v39 }
 0x2b1   :  { %v580_v40 = vpop.f32.mrf.mxu1 }
 0x2b2   :  { %v584_v44 = vmul.f32 %v580_v40, %v580_v40 }
 0x2b3   :  { %v1170_v45 = vpop.f32.mrf.mxu1 }
 0x2b4   :  { %v586_v46 = vrot.slane %v584_v44, 7  ;;  %v1216_v45 = vld [vmem:[%s1845_s0 + $0x8] sm:$0xff] }
 0x2b6   :  { %v588_v47 = vsub.f32 %v580_v40, %v586_v46 }
 0x2b8   :  { %v589_v48 = vadd.f32 1e-05, %v588_v47 }
 0x2ba   :  { %1213 = vrsqrt.f32 %v589_v48 }
 0x2c7   :  { %v1214_v49 = vpop.eup %1213 }
 0x2c8   :  { %v592_v50 = vrot.slane %v1214_v49, 6 }
 0x2ca   :  { %v594_v51 = vmul.f32 %v592_v50, %v1548_v58 }
 0x2cc   :  { %v596_v54 = vrot.slane %v594_v51, 3  ;;  %v606_v1 = vrot.slane %v594_v51, %v605_v53  ;;  %v1217_v53 = vld [vmem:[%s1845_s0 + $0x10] sm:$0xff] }
 0x2ce   :  { %v598_v55 = vmul.f32 %v596_v54, %v580_v40  ;;  %v607_v3 = vmul.f32 %v606_v1, %v1631_v63  ;;  %v608_v7 = vmul.f32 %v606_v1, %v1629_v0  ;;  %v609_v14 = vmul.f32 %v606_v1, %v1635_v15 }
 0x2cf   :  { %v610_v18 = vmul.f32 %v606_v1, %v1644_v26 }
 0x2d0   :  { %v600_v59 = vrot.slane %v598_v55, 4 }
 0x2d2   :  { %v602_v2 = vsub.f32 %v1548_v58, %v600_v59  ;;  %v1218_v59 = vld [vmem:[%s1845_s0 + $0x18] sm:$0xff] }
 0x2d4   :  { %v614_v4 = vrot.slane %v602_v2, %v613_v60 }
 0x2d6   :  { %v615_v21 = vadd.f32 %v614_v4, %v607_v3  ;;  %v616_v24 = vadd.f32 %v614_v4, %v608_v7  ;;  %v617_v27 = vadd.f32 %v614_v4, %v609_v14  ;;  %v618_v30 = vadd.f32 %v614_v4, %v610_v18 }
 0x2d8   :  { %v619_v33 = vmax.f32 %v615_v21, 0.0  ;;  %v620_v36 = vmax.f32 %v616_v24, 0.0  ;;  %v621_v38 = vmax.f32 %v617_v27, 0.0  ;;  %v622_v41 = vmax.f32 %v618_v30, 0.0 }
 0x2da   :  { %v627_v61 = vrot.slane %v619_v33, 7  ;;  %775 = vmatprep.mubr.f32.mxu0 %v619_v33  ;;  %v643_v42 = vrot.slane %v619_v33, 1  ;;  %v644_v62 = vrot.slane %v620_v36, 1  ;;  %v646_v63 = vrot.slane %v621_v38, 1 }
 0x2db   :  { %v648_v10 = vrot.slane %v622_v41, 1  ;;  %v628_v11 = vrot.slane %v620_v36, 7  ;;  %v630_v16 = vrot.slane %v621_v38, 7  ;;  %v632_v19 = vrot.slane %v622_v41, 7 }
 0x2dc   :  { %v638_v0 = vsel %vm100_vm1, 0.0, %v627_v61  ;;  %v645_v15 = vsel %vm248_vm3, %v643_v42, %v644_v62  ;;  %v647_v26 = vsel %vm248_vm3, %v644_v62, %v646_v63 }
 0x2dd   :  { %897 = vmatmul.mubr.msk.f32.vlgmr.msra.gmra.mxu0 %vm1561_vm2, %v638_v0  ;;  %1203 = vmatprep.mubr.f32.mxu1 %v645_v15  ;;  %v649_v12 = vsel %vm248_vm3, %v646_v63, %v648_v10  ;;  %v629_v13 = vsel %vm100_vm1, %v627_v61, %v628_v11  ;;  %v654_v17 = vsel %vm248_vm3, %v648_v10, 0.0  ;;  %v631_v37 = vsel %vm100_vm1, %v628_v11, %v630_v16 }
 0x2de   :  { %780 = vmatprep.mubr.f32.mxu0 %v620_v36  ;;  %1204 = vmatmul.mubr.msk.f32.vlgmr.msra.gmra.mxu1 %vm1566_vm4, %v647_v26  ;;  %v633_v43 = vsel %vm100_vm1, %v630_v16, %v632_v19 }
 0x2df   :  { %1206 = vmatprep.mubr.f32.mxu1 %v649_v12 }
 0x2e1   :  { %781 = vmatmul.mubr.f32.gmra.mxu0 %v629_v13 }
 0x2e2   :  { %785 = vmatprep.mubr.f32.mxu0 %v621_v38  ;;  %1207 = vmatmul.mubr.msk.f32.gmra.mxu1 %vm1578_vm5, %v654_v17 }
 0x2e5   :  { %898 = vmatmul.mubr.msk.f32.gmra.mxu0 %vm1588_vm6, %v631_v37 }
 0x2e6   :  { %790 = vmatprep.mubr.f32.mxu0 %v622_v41 }
 0x2e9   :  { %791 = vmatmul.mubr.f32.gmra.mxu0 %v633_v43 }
 0x39d   :  { %v1031_v22 = vpop.f32.mrf.mxu0 }
 0x39e   :  { %v1205_v25 = vpop.f32.mrf.mxu1 }
 0x39f   :  { %v1032_v28 = vpop.f32.mrf.mxu0 }
 0x3a0   :  { %v1033_v29 = vadd.f32 %v1032_v28, %v1031_v22  ;;  %v862_v32 = vpop.f32.mrf.mxu1 }
 0x3a1   :  { %v1034_v52 = vpop.f32.mrf.mxu0 }
 0x3a2   :  { %v778_v31 = vadd.f32 %v1033_v29, %v710_v23  ;;  %v1208_v56 = vpop.f32.mrf.mxu1 }
 0x3a3   :  { %v1035_v8 = vpop.f32.mrf.mxu0 }
 0x3a4   :  { %v863_v34 = vadd.f32 %v862_v32, %v778_v31  ;;  %v1036_v35 = vadd.f32 %v1035_v8, %v1034_v52  ;;  %v872_v48 = vpop.f32.mrf.mxu1 }
 0x3a5   :  { %v1037_v57 = vpop.f32.mrf.mxu0 }
 0x3a6   :  { %v881_v6 = vadd.f32 %v1215_v5, %v863_v34  ;;  %v783_v9 = vadd.f32 %v1036_v35, %v710_v23 }
 0x3a7   :  { %v1038_v39 = vpop.f32.mrf.mxu0 }
 0x3a8   :  { %885 = vst [vmem:[%s1849_s5] sm:$0xff] %v881_v6  ;;  %v868_v58 = vadd.f32 %v1205_v25, %v783_v9  ;;  %v1039_v40 = vadd.f32 %v1038_v39, %v1037_v57 }
 0x3a9   :  { %v1040_v44 = vpop.f32.mrf.mxu0 }
 0x3aa   :  { %v882_v46 = vadd.f32 %v1216_v45, %v868_v58  ;;  %v788_v47 = vadd.f32 %v1039_v40, %v710_v23 }
 0x3ab   :  { %v1041_v49 = vpop.f32.mrf.mxu0 }
 0x3ac   :  { %886 = vst [vmem:[%s1849_s5 + $0x8] sm:$0xff] %v882_v46  ;;  %v873_v50 = vadd.f32 %v872_v48, %v788_v47  ;;  %v1042_v51 = vadd.f32 %v1041_v49, %v1040_v44 }
 0x3ae   :  { %v883_v54 = vadd.f32 %v1217_v53, %v873_v50  ;;  %v793_v55 = vadd.f32 %v1042_v51, %v710_v23 }
 0x3b0   :  { %887 = vst [vmem:[%s1849_s5 + $0x10] sm:$0xff] %v883_v54  ;;  %v878_v1 = vadd.f32 %v1208_v56, %v793_v55 }
 0x3b2   :  { %v884_v60 = vadd.f32 %v1218_v59, %v878_v1 }
 0x3b4   :  { %888 = vst [vmem:[%s1849_s5 + $0x18] sm:$0xff] %v884_v60 }

</bundles_post_ra>
